<compile_context>
chip_gen: v6e
topology: v6e:2x2x1
jax: 0.10.0
libtpu: 0.0.40
codegen_flags: <defaults>
</compile_context>

<pallas_src>
import functools

import jax
import jax.numpy as jnp
from jax.experimental import pallas as pl
from jax.experimental.pallas import tpu as pltpu


_SMALL_BYPASS_BYTES = 1 << 20          # below ~1 MiB the fused XLA multiply wins
_SUBLANE_MULT = {1: 32, 2: 16, 4: 8}   # packed sublane multiple per itemsize


def _scale_kernel(scale_ref, x_ref, o_ref):
    # scale_ref: (1, 1) f32 in SMEM; x_ref/o_ref: (block_rows, lanes) tiles in VMEM.
    # Multiply in f32 (VPU has huge slack in an HBM-bound kernel) and cast once
    # at the store -> no double rounding for bf16 inputs.
    s = scale_ref[0, 0]
    o_ref[...] = (x_ref[...].astype(jnp.float32) * s).astype(o_ref.dtype)


@functools.lru_cache(maxsize=1)
def _tpu_config():
    """Returns (target_block_bytes, vmem_limit_bytes_or_None, split_across_cores)."""
    try:
        kind = jax.devices()[0].device_kind.lower()
    except Exception:  # pragma: no cover - defensive; fall back to safe defaults
        kind = ""
    if "v7" in kind:
        # 8 MiB tiles -> (in + out) x double-buffer = 32 MiB of VMEM buffering,
        # which needs the scoped limit raised above the 32 MiB default
        # (64 MiB physical on v7x). Two TensorCores -> keep >= 2 row tiles.
        return 8 << 20, 48 << 20, True
    if "v6" in kind:
        # 4 MiB tiles (16 MiB of buffering) fit the 32 MiB scoped default.
        return 4 << 20, None, False
    # v5e / unknown: 2 MiB tiles fit the 16 MiB scoped default; already at roofline.
    return 2 << 20, None, False


def _xla_scale(x, scale_f32):
    # Fallback path (ragged / tiny tensors): single fused multiply, 1R + 1W of HBM.
    return (x.astype(jnp.float32) * scale_f32).astype(x.dtype)


def scale_forward(x, scale, *, donate=False, use_kernel=None):
    """y = x * scale with the multiply done in a tiled Pallas kernel.

    x: any-shaped float array (e.g. NCHW).
    scale: scalar (stored as float32, matching nn.Parameter(torch.tensor(scale))).
    donate: set True when the caller no longer needs x; the kernel output then
        aliases x's HBM buffer (input_output_aliases), saving a full allocation.
    use_kernel: None = auto (ragged / <1 MiB tensors use plain XLA), or force.
    """
    orig_shape = x.shape
    orig_dtype = x.dtype
    n = x.size
    itemsize = jnp.dtype(orig_dtype).itemsize
    scale_f32 = jnp.asarray(scale, dtype=jnp.float32)

    # Widest lane count that divides n exactly (no pad / no tail-slice copies).
    lanes = next((c for c in (1024, 512, 256, 128) if n and n % c == 0), None)

    if use_kernel is None:
        use_kernel = lanes is not None and n * itemsize >= _SMALL_BYPASS_BYTES
    if not use_kernel or lanes is None or n == 0:
        # TODO(synk): a bulk-kernel + jnp-tail split could cover ragged sizes,
        # but the plain XLA multiply already achieves 1R+1W HBM traffic.
        return _xla_scale(x, scale_f32)

    rows = n // lanes
    x2d = x.reshape(rows, lanes)

    target_bytes, vmem_limit, split_cores = _tpu_config()
    sub = _SUBLANE_MULT.get(itemsize, 8)
    block_rows = max(sub, (target_bytes // (lanes * itemsize)) // sub * sub)
    if split_cores and rows >= 2 * sub:
        # v7x: never collapse to a single tile -> both TensorCores get work.
        half = pl.cdiv(pl.cdiv(rows, 2), sub) * sub
        block_rows = min(block_rows, half)
    if block_rows >= rows:
        block_rows = rows  # full extent: (8,128)-divisibility not required
    grid = (pl.cdiv(rows, block_rows),)

    scale_smem = scale_f32.reshape(1, 1)

    out2d = pl.pallas_call(
        _scale_kernel,
        out_shape=jax.ShapeDtypeStruct((rows, lanes), orig_dtype),
        grid_spec=pl.GridSpec(
            grid=grid,
            in_specs=[
                pl.BlockSpec(memory_space=pltpu.SMEM),                 # scalar scale
                pl.BlockSpec((block_rows, lanes), lambda i: (i, 0)),   # row tile
            ],
            out_specs=pl.BlockSpec((block_rows, lanes), lambda i: (i, 0)),
        ),
        compiler_params=pltpu.CompilerParams(
            dimension_semantics=("parallel",),
            vmem_limit_bytes=vmem_limit,
        ),
        input_output_aliases=({1: 0} if donate else {}),
    )(scale_smem, x2d)

    return out2d.reshape(orig_shape)


if __name__ == "__main__":
    key = jax.random.PRNGKey(0)

    # Small NCHW input consistent with typical usage of Scale after a conv head.
    x = jax.random.normal(key, (2, 4, 16, 16), dtype=jnp.float32)
    scale_param = jnp.float32(1.0)

    # Auto path (small tensor -> XLA bypass).
    y = scale_forward(x, scale_param)
    jax.block_until_ready(y)
    assert y.shape == x.shape and y.dtype == x.dtype
    assert jnp.allclose(y, x * scale_param, atol=1e-6, rtol=1e-6)

    # Force the Pallas kernel on the small shape (single full-extent block).
    y_k = scale_forward(x, jnp.float32(2.5), use_kernel=True)
    jax.block_until_ready(y_k)
    assert jnp.allclose(y_k, x * 2.5, atol=1e-6, rtol=1e-6)

    # Larger input that exercises the tiled kernel path (>= 1 MiB, multi-block).
    key2 = jax.random.PRNGKey(1)
    x_big = jax.random.normal(key2, (4, 256, 32, 32), dtype=jnp.float32)  # 4 MiB
    y_big = scale_forward(x_big, jnp.float32(0.75))
    jax.block_until_ready(y_big)
    assert jnp.allclose(y_big, x_big * 0.75, atol=1e-6, rtol=1e-6)

    # bf16 input through the kernel: product computed in f32, stored as bf16.
    x_bf16 = x_big.astype(jnp.bfloat16)
    y_bf16 = scale_forward(x_bf16, jnp.float32(2.5))
    jax.block_until_ready(y_bf16)
    assert y_bf16.dtype == jnp.bfloat16
    ref_bf16 = (x_bf16.astype(jnp.float32) * 2.5).astype(jnp.bfloat16)
    assert jnp.allclose(y_bf16.astype(jnp.float32), ref_bf16.astype(jnp.float32),
                        atol=1e-2, rtol=1e-2)

    # Donated input: output aliases x's HBM buffer (no extra allocation).
    x_don = jax.random.normal(key2, (4, 256, 32, 32), dtype=jnp.float32)
    ref_don = x_don * -0.5
    y_don = scale_forward(x_don, jnp.float32(-0.5), donate=True)
    jax.block_until_ready(y_don)
    assert jnp.allclose(y_don, ref_don, atol=1e-6, rtol=1e-6)

    # Ragged size (n % 128 != 0): clean XLA fallback, no pad/slice copies.
    x_rag = jax.random.normal(key, (3, 5, 7), dtype=jnp.float32)
    y_rag = scale_forward(x_rag, jnp.float32(-1.5))
    jax.block_until_ready(y_rag)
    assert y_rag.shape == x_rag.shape
    assert jnp.allclose(y_rag, x_rag * -1.5, atol=1e-6, rtol=1e-6)

    print("KERNEL_OK")
</pallas_src>

<mosaic_0001>
module attributes {stable_mosaic.version = 11 : i64} {
  func.func @_scale_kernel(%arg0: i32, %arg1: memref<1x1xf32, #tpu.memory_space<smem>>, %arg2: memref<2x1024xf32, #tpu.memory_space<vmem>>, %arg3: memref<2x1024xf32, #tpu.memory_space<vmem>>) attributes {dimension_semantics = [#tpu.dimension_semantics<parallel>], iteration_bounds = array<i64: 1>, scalar_prefetch = 0 : i64, scratch_operands = 0 : i64, tpu.core_type = #tpu.core_type<tc>, window_params = [{transform_indices = @transform_0, window_bounds = array<i64: 1, 1>}, {transform_indices = @transform_1, window_bounds = array<i64: 2, 1024>}, {transform_indices = @transform_2, window_bounds = array<i64: 2, 1024>}]} {
    %c0 = arith.constant 0 : index
    %c0_0 = arith.constant 0 : index
    %0 = memref.load %arg1[%c0, %c0_0] : memref<1x1xf32, #tpu.memory_space<smem>>
    %c0_1 = arith.constant 0 : index
    %c0_2 = arith.constant 0 : index
    %1 = vector.load %arg2[%c0_1, %c0_2] : memref<2x1024xf32, #tpu.memory_space<vmem>>, vector<2x1024xf32>
    %2 = vector.broadcast %0 : f32 to vector<2x1024xf32>
    %3 = arith.mulf %1, %2 : vector<2x1024xf32>
    %c0_3 = arith.constant 0 : index
    %c0_4 = arith.constant 0 : index
    %4 = vector.load %arg3[%c0_3, %c0_4] : memref<2x1024xf32, #tpu.memory_space<vmem>>, vector<2x1024xf32>
    tpu.vector_store %arg3[%c0_3, %c0_4], %3 {strides = array<i32>} : memref<2x1024xf32, #tpu.memory_space<vmem>>, vector<2x1024xf32>,
    return
  }
  func.func @transform_0(%arg0: i32) -> (i32, i32) {
    %c0_i32 = arith.constant 0 : i32
    %c0_i32_0 = arith.constant 0 : i32
    %c0_i32_1 = arith.constant 0 : i32
    return %c0_i32, %c0_i32_0 : i32, i32
  }
  func.func @transform_1(%arg0: i32) -> (i32, i32) {
    %c0_i32 = arith.constant 0 : i32
    %c0_i32_0 = arith.constant 0 : i32
    return %arg0, %c0_i32 : i32, i32
  }
  func.func @transform_2(%arg0: i32) -> (i32, i32) {
    %c0_i32 = arith.constant 0 : i32
    %c0_i32_0 = arith.constant 0 : i32
    return %arg0, %c0_i32 : i32, i32
  }
}

</mosaic_0001>

<bundles_post_ra>
// kernel: tpu_custom_call.1
= control target key start
LH: loop header
LB: loop body
LE: loop exit
PB: predicated region body
PF: predicated region fallthrough
CT: control target
= control target key end

     0   :  { %8 = vsyncpa [#allocation4], 0  ;;  %s120_s0 = inlined_call_operand.<no memory space> [shape: f32[1,1], index: 0, kind: input, shape index: {}]   ;;  %s121_s1 = inlined_call_operand.hbm [shape: f32[2,1024], index: 1, kind: input, shape index: {}]   ;;  %s122_s2 = inlined_call_operand.hbm [shape: f32[2,1024], index: 2, kind: output, shape index: {}]  }
   0x1   :  { %9 = vsyncpa [#allocation5], 0  ;;  %s94_s9 = smov [#allocation3]  }
   0x2   :  { %s18_s10 = sshll.u32 %s94_s9, 4  ;;  %s19_s10 = int_to_ptr.vmem [resolvable:$true] %s18_s10 }
   0x3   :  { %s58_s11 = scalar_lea.vmem %s19_s10, 256  ;;  %p63_p1 = scmp.lt.s32.totalorder %s19_s10, %s19_s10 }
   0x4   :  { %p59_p0 = scmp.ne.s32.totalorder %s19_s10, %s58_s11  ;;  %p64_p2 = scmp.lt.s32.totalorder %s58_s11, %s58_s11 }
   0x6   :  { %p65_p3 = por %p64_p2, %p63_p1 }
   0x8   :  { %p66_p4 = pnand %p65_p3, %p59_p0 }
   0xa   :  { %69 = shalt.err (!%p66_p4)
}
   0xb   :  { %21 = dma.hbm_to_vmem [thread:$0]  %s121_s1, 256, %s19_s10, [#allocation4]  }
   0xc   :  { %90 = dma.done.wait [#allocation4], 256  }
   0xd   :  { %91 = vsyncadd [#allocation4], 4294967040  ;;  %v28_v0 = vstv %s120_s0  ;;  %s95_s16 = smov [#allocation6]   ;;  %v26_v1 = vld [vmem:[#allocation3] sm:$0xff]  ;;  %v27_v2 = vld [vmem:[#allocation3 + $0x8] sm:$0xff] }
   0xe   :  { %s39_s17 = sshll.u32 %s95_s16, 4  ;;  %v29_v3 = vmul.f32 %v28_v0, %v26_v1  ;;  %v30_v4 = vmul.f32 %v28_v0, %v27_v2  ;;  %s40_s17 = int_to_ptr.vmem [resolvable:$true] %s39_s17 }
   0xf   :  { %s70_s18 = scalar_lea.vmem %s40_s17, 256  ;;  %p75_p6 = scmp.lt.s32.totalorder %s40_s17, %s40_s17 }
  0x10   :  { %31 = vst [vmem:[#allocation6] sm:$0xff] %v29_v3  ;;  %32 = vst [vmem:[#allocation6 + $0x8] sm:$0xff] %v30_v4  ;;  %p71_p5 = scmp.ne.s32.totalorder %s40_s17, %s70_s18  ;;  %p76_p7 = scmp.lt.s32.totalorder %s70_s18, %s70_s18 }
  0x12   :  { %p77_p8 = por %p76_p7, %p75_p6 }
  0x14   :  { %p78_p9 = pnand %p77_p8, %p71_p5 }
  0x16   :  { %81 = shalt.err (!%p78_p9)
}
  0x17   :  { %42 = dma.vmem_to_hbm [thread:$0]  %s40_s17, 256, %s122_s2, [#allocation5]  }
  0x18   :  { %92 = dma.done.wait [#allocation5], 256  }
  0x19   :  { %93 = vsyncadd [#allocation5], 4294967040 }
  0x1a   :  { %46 = vsyncpa [#allocation4], 1 }
  0x1b   :  { %47 = vsyncpa [#allocation5], 1 }

</bundles_post_ra>
